<compile_context>
chip_gen: v5e
topology: v5e:2x2
jax: 0.10.0
libtpu: 0.0.40
codegen_flags: <defaults>
</compile_context>

<pallas_src>
import functools

import numpy as np
import jax
import jax.numpy as jnp
from jax.experimental import pallas as pl
from jax.experimental.pallas import tpu as pltpu


def _lob_kernel(x_ref, o_ref, *, limit, shift):
    # Compute in f32 (v5e VPU/EUP has no bf16 path); store back in the output dtype.
    x = x_ref[...].astype(jnp.float32)
    y = limit * jax.nn.sigmoid(x - shift) - 1.0
    o_ref[...] = y.astype(o_ref.dtype)


def lob(x, limit=1.804):
    """Pallas TPU implementation of LOB.forward: limit*sigmoid(x - log(limit-1)) - 1."""
    shift = float(np.log(limit - 1.0))
    orig_shape = x.shape
    orig_dtype = x.dtype
    itemsize = jnp.dtype(orig_dtype).itemsize

    flat = x.reshape(-1)
    n = flat.shape[0]

    # Lane width: large multiple of 128 for unmasked, full-width vector stores.
    lanes = 1024 if n >= 1024 else 128

    # Pad the flat vector only if needed (skipped in the common aligned case).
    n_pad = pl.cdiv(n, lanes) * lanes
    padded = n_pad != n
    if padded:
        flat = jnp.pad(flat, (0, n_pad - n))
    rows = n_pad // lanes
    x2d = flat.reshape(rows, lanes)

    # Tile rows: target ~2 MiB per tile (double-buffered in+out stays <= ~8 MiB,
    # safe for v7x's 64 MiB VMEM and well within the 32 MiB scoped default).
    target_tile_bytes = 2 * 1024 * 1024
    tr = min(rows, max(8, target_tile_bytes // (lanes * itemsize)))
    if rows >= 8:
        tr = max(8, (tr // 8) * 8)   # keep sublane dim a multiple of 8
    else:
        tr = rows                    # block equals full array dim (small inputs)

    grid = (pl.cdiv(rows, tr),)      # ragged last block handled by Pallas

    kernel = functools.partial(_lob_kernel, limit=float(limit), shift=shift)

    cost = pl.CostEstimate(
        flops=4 * n_pad,
        transcendentals=n_pad,
        bytes_accessed=2 * n_pad * itemsize,
    )

    out2d = pl.pallas_call(
        kernel,
        out_shape=jax.ShapeDtypeStruct((rows, lanes), orig_dtype),
        grid=grid,
        in_specs=[pl.BlockSpec((tr, lanes), lambda i: (i, 0))],
        out_specs=pl.BlockSpec((tr, lanes), lambda i: (i, 0)),
        compiler_params=pltpu.CompilerParams(
            dimension_semantics=("parallel",),
        ),
        cost_estimate=cost,
    )(x2d)

    if padded:
        out = out2d.reshape(-1)[:n].reshape(orig_shape)
    else:
        out = out2d.reshape(orig_shape)
    return out


def lob_ref(x, limit=1.804):
    shift = np.log(limit - 1.0)
    return limit * jax.nn.sigmoid(x - shift) - 1.0


if __name__ == "__main__":
    key = jax.random.PRNGKey(0)
    x = jax.random.normal(key, (2, 4, 16, 16), dtype=jnp.float32)

    out = lob(x)
    out = jax.block_until_ready(out)

    ref = lob_ref(x)
    np.testing.assert_allclose(np.asarray(out), np.asarray(ref), rtol=1e-5, atol=1e-5)

    # Also exercise a non-aligned size (ragged / padded path).
    x2 = jax.random.normal(jax.random.PRNGKey(1), (3, 5, 7, 11), dtype=jnp.float32)
    out2 = jax.block_until_ready(lob(x2))
    np.testing.assert_allclose(np.asarray(out2), np.asarray(lob_ref(x2)),
                               rtol=1e-5, atol=1e-5)

    print("KERNEL_OK")
</pallas_src>

<mosaic_0001>
module attributes {stable_mosaic.version = 11 : i64} {
  func.func @_lob_kernel(%arg0: i32, %arg1: memref<2x1024xf32, #tpu.memory_space<vmem>>, %arg2: memref<2x1024xf32, #tpu.memory_space<vmem>>) attributes {dimension_semantics = [#tpu.dimension_semantics<parallel>], iteration_bounds = array<i64: 1>, scalar_prefetch = 0 : i64, scratch_operands = 0 : i64, tpu.core_type = #tpu.core_type<tc>, window_params = [{transform_indices = @transform_0, window_bounds = array<i64: 2, 1024>}, {transform_indices = @transform_1, window_bounds = array<i64: 2, 1024>}]} {
    %c0 = arith.constant 0 : index
    %c0_0 = arith.constant 0 : index
    %0 = vector.load %arg1[%c0, %c0_0] : memref<2x1024xf32, #tpu.memory_space<vmem>>, vector<2x1024xf32>
    %cst = arith.constant -0.21815601 : f32
    %1 = vector.broadcast %cst : f32 to vector<2x1024xf32>
    %2 = arith.subf %0, %1 : vector<2x1024xf32>
    %3 = arith.negf %2 : vector<2x1024xf32>
    %4 = math.exp %3 : vector<2x1024xf32>
    %cst_1 = arith.constant 1.000000e+00 : f32
    %5 = vector.broadcast %cst_1 : f32 to vector<2x1024xf32>
    %6 = arith.addf %5, %4 : vector<2x1024xf32>
    %7 = arith.divf %5, %6 : vector<2x1024xf32>
    %cst_2 = arith.constant 1.804000e+00 : f32
    %8 = vector.broadcast %cst_2 : f32 to vector<2x1024xf32>
    %9 = arith.mulf %8, %7 : vector<2x1024xf32>
    %cst_3 = arith.constant 1.000000e+00 : f32
    %10 = vector.broadcast %cst_3 : f32 to vector<2x1024xf32>
    %11 = arith.subf %9, %10 : vector<2x1024xf32>
    %c0_4 = arith.constant 0 : index
    %c0_5 = arith.constant 0 : index
    %12 = vector.load %arg2[%c0_4, %c0_5] : memref<2x1024xf32, #tpu.memory_space<vmem>>, vector<2x1024xf32>
    tpu.vector_store %arg2[%c0_4, %c0_5], %11 {strides = array<i32>} : memref<2x1024xf32, #tpu.memory_space<vmem>>, vector<2x1024xf32>,
    return
  }
  func.func @transform_0(%arg0: i32) -> (i32, i32) {
    %c0_i32 = arith.constant 0 : i32
    %c0_i32_0 = arith.constant 0 : i32
    return %arg0, %c0_i32 : i32, i32
  }
  func.func @transform_1(%arg0: i32) -> (i32, i32) {
    %c0_i32 = arith.constant 0 : i32
    %c0_i32_0 = arith.constant 0 : i32
    return %arg0, %c0_i32 : i32, i32
  }
}

</mosaic_0001>

<bundles_post_ra>
// kernel: tpu_custom_call.1
= control target key start
LH: loop header
LB: loop body
LE: loop exit
PB: predicated region body
PF: predicated region fallthrough
CT: control target
= control target key end

     0   :  { %6 = vsyncpa [#allocation3], 0  ;;  %s174_s0 = inlined_call_operand.hbm [shape: f32[2,1024], index: 0, kind: input, shape index: {}]   ;;  %s175_s1 = inlined_call_operand.hbm [shape: f32[2,1024], index: 1, kind: output, shape index: {}]  }
   0x1   :  { %7 = vsyncpa [#allocation4], 0  ;;  %s13_s8 = sshll.u32 %s174_s0, 4  ;;  %s156_s9 = smov [#allocation2]   ;;  %s14_s8 = int_to_ptr.hbm [resolvable:$true] %s13_s8 }
   0x2   :  { %s15_s10 = sshll.u32 %s156_s9, 4  ;;  %s16_s10 = int_to_ptr.vmem [resolvable:$true] %s15_s10 }
   0x3   :  { %18 = dma.hbm_to_vmem [thread:$0]  %s14_s8, 256, %s16_s10, [#allocation3]  }
   0x4   :  { %152 = dma.done.wait [#allocation3], 256  }
   0x5   :  { %153 = vsyncadd [#allocation3], 4294967040  ;;  %v23_v0 = vld [vmem:[#allocation2] sm:$0xff]  ;;  %v24_v1 = vld [vmem:[#allocation2 + $0x8] sm:$0xff]  ;;  %s157_s0 = smov [#allocation5]   ;;  %s78_s14 = sshll.u32 %s175_s1, 4  ;;  %s79_s14 = int_to_ptr.hbm [resolvable:$true] %s78_s14 }
   0x6   :  { %v88_v2 = vadd.f32 0.21815601, %v23_v0  ;;  %v89_v3 = vadd.f32 0.21815601, %v24_v1  ;;  %s76_s11 = sshll.u32 %s157_s0, 4  ;;  %s77_s11 = int_to_ptr.vmem [resolvable:$true] %s76_s11 }
   0x8   :  { %v90_v4 = vmul.f32 -1.442695, %v88_v2  ;;  %v91_v5 = vmul.f32 -1.442695, %v89_v3 }
   0xa   :  { %96 = vpow2.f32 %v90_v4 }
   0xb   :  { %98 = vpow2.f32 %v91_v5 }
  0x10   :  { %v97_v6 = vpop.eup %96 }
  0x11   :  { %v99_v7 = vpop.eup %98  ;;  %v33_v8 = vadd.f32 1.0, %v97_v6 }
  0x12   :  { %v34_v9 = vadd.f32 1.0, %v99_v7 }
  0x13   :  { %100 = vrcp.f32 %v33_v8  ;;  %vm40_vm0 = vweird.f32 %v33_v8  ;;  %v46_v13 = vand.u32 2147483648, %v33_v8  ;;  %v44_v16 = vand.u32 2147483647, %v33_v8 }
  0x14   :  { %102 = vrcp.f32 %v34_v9  ;;  %v61_v17 = vand.u32 2147483648, %v34_v9  ;;  %vm55_vm2 = vweird.f32 %v34_v9  ;;  %v59_v19 = vand.u32 2147483647, %v34_v9 }
  0x15   :  { %v47_v21 = vor.u32 1.1754944e-38, %v46_v13  ;;  %vm45_vm5 = vcmp.eq.f32.partialorder %v44_v16, 8.507059e+37 }
  0x16   :  { %v62_v24 = vor.u32 1.1754944e-38, %v61_v17  ;;  %vm60_vm7 = vcmp.eq.f32.partialorder %v59_v19, 8.507059e+37 }
  0x19   :  { %v101_v10 = vpop.eup %100 }
  0x1a   :  { %v103_v11 = vpop.eup %102  ;;  %v36_v12 = vmul.f32 %v101_v10, %v33_v8  ;;  %vm41_vm1 = vweird.f32 %v101_v10 }
  0x1b   :  { %v51_v14 = vmul.f32 %v103_v11, %v34_v9  ;;  %vm56_vm3 = vweird.f32 %v103_v11  ;;  %vm42_vm4 = vmor %vm40_vm0, %vm41_vm1 }
  0x1c   :  { %v37_v15 = vsub.f32 1.0, %v36_v12  ;;  %vm57_vm6 = vmor %vm55_vm2, %vm56_vm3 }
  0x1d   :  { %v52_v18 = vsub.f32 1.0, %v51_v14 }
  0x1e   :  { %v38_v20 = vmul.f32 %v101_v10, %v37_v15 }
  0x1f   :  { %v53_v22 = vmul.f32 %v103_v11, %v52_v18 }
  0x20   :  { %v39_v23 = vadd.f32 %v101_v10, %v38_v20 }
  0x21   :  { %v54_v25 = vadd.f32 %v103_v11, %v53_v22 }
  0x22   :  { %v43_v26 = vsel %vm42_vm4, %v101_v10, %v39_v23 }
  0x23   :  { %v48_v27 = vsel %vm45_vm5, %v47_v21, %v43_v26  ;;  %v58_v28 = vsel %vm57_vm6, %v103_v11, %v54_v25 }
  0x24   :  { %v65_v29 = vmul.f32 1.804, %v48_v27  ;;  %v63_v30 = vsel %vm60_vm7, %v62_v24, %v58_v28 }
  0x25   :  { %v66_v31 = vmul.f32 1.804, %v63_v30 }
  0x26   :  { %v92_v32 = vadd.f32 -1.0, %v65_v29 }
  0x27   :  { %v93_v33 = vadd.f32 -1.0, %v66_v31 }
  0x28   :  { %69 = vst [vmem:[#allocation5] sm:$0xff] %v92_v32 }
  0x29   :  { %70 = vst [vmem:[#allocation5 + $0x8] sm:$0xff] %v93_v33 }
  0x2a   :  { %81 = dma.vmem_to_hbm [thread:$0]  %s77_s11, 256, %s79_s14, [#allocation4]  }
  0x2b   :  { %154 = dma.done.wait [#allocation4], 256  }
  0x2c   :  { %155 = vsyncadd [#allocation4], 4294967040 }
  0x2d   :  { %86 = vsyncpa [#allocation3], 1 }
  0x2e   :  { %87 = vsyncpa [#allocation4], 1 }

</bundles_post_ra>
